<compile_context>
chip_gen: v6e
topology: v6e:2x2x1
jax: 0.10.0
libtpu: 0.0.40
codegen_flags: <defaults>
</compile_context>

<pallas_src>
from functools import partial

import jax
import jax.numpy as jnp
from jax.experimental import pallas as pl
from jax.experimental.pallas import tpu as pltpu


# --------------------------------------------------------------------------
# Model hyper-parameters (small demo shapes, padded to TPU lane width 128)
# --------------------------------------------------------------------------
NUM_NODES = 64
BLOOM_DIM = 48
TRANSE_DIM = 32
BLOOM_PROJ = 32
TRANSE_PROJ = 32
ENC_DIM = BLOOM_PROJ + TRANSE_PROJ      # 64
HIDDEN = 64
OUT = 64
NUM_REL = 5
NUM_EDGES = 200
GAMMA = 12.0

F_PAD = 128                              # padded raw-feature width (bloom ++ transE)
D_PAD = 128                              # padded width for enc-out / hidden / out


def _vmem_spec():
    return pl.BlockSpec(memory_space=pltpu.MemorySpace.VMEM)


# --------------------------------------------------------------------------
# Fused kernel: encoder -> SAGE -> ReLU -> SAGE -> gather -> RotatE score
# --------------------------------------------------------------------------
def _fused_kernel(gamma,
                  x_ref, adj_ref, gh_ref, gt_ref, rel_ref,
                  wenc_ref, benc_ref, w1_ref, b1_ref, w2_ref, b2_ref,
                  o_ref):
    f32 = jnp.float32
    bf16 = jnp.bfloat16

    # 1) Hybrid node encoder: one block-diagonal matmul (lane-dense, bf16 -> f32 acc)
    x0 = jnp.dot(x_ref[...], wenc_ref[...], preferred_element_type=f32) + benc_ref[...]
    x0b = x0.astype(bf16)

    # 2) GraphSAGE layer 1 (mean aggregation via normalized dense adjacency).
    #    out = [agg | x] @ vstack(W_nb, W_self) + b  -> single MXU call, N = 128 lanes.
    agg1 = jnp.dot(adj_ref[...], x0b, preferred_element_type=f32).astype(bf16)
    h1 = jnp.dot(jnp.concatenate([agg1, x0b], axis=-1), w1_ref[...],
                 preferred_element_type=f32) + b1_ref[...]
    h1b = jnp.maximum(h1, 0.0).astype(bf16)

    # 3) GraphSAGE layer 2 (no activation)
    agg2 = jnp.dot(adj_ref[...], h1b, preferred_element_type=f32).astype(bf16)
    h2 = jnp.dot(jnp.concatenate([agg2, h1b], axis=-1), w2_ref[...],
                 preferred_element_type=f32) + b2_ref[...]

    # 4) Gather head / tail rows with one-hot selector matmuls (stays on the MXU, f32)
    h_emb = jnp.dot(gh_ref[...], h2, preferred_element_type=f32)
    t_emb = jnp.dot(gt_ref[...], h2, preferred_element_type=f32)

    # 5) RotatE decoder (f32 elementwise; cos/sin/sqrt run on the EUP slot)
    d2 = rel_ref.shape[-1]
    h_re, h_im = h_emb[:, :d2], h_emb[:, d2:2 * d2]
    t_re, t_im = t_emb[:, :d2], t_emb[:, d2:2 * d2]
    cosr = jnp.cos(rel_ref[...])
    sinr = jnp.sin(rel_ref[...])
    d_re = h_re * cosr - h_im * sinr - t_re
    d_im = h_re * sinr + h_im * cosr - t_im
    dist = jnp.sqrt(d_re * d_re + d_im * d_im + 1e-12)
    score = gamma - jnp.sum(dist, axis=-1, keepdims=True)        # (B_pad, 1)
    o_ref[...] = jnp.broadcast_to(score, o_ref.shape)            # lane-dense store


# --------------------------------------------------------------------------
# Jitted forward: jittable subgraph extraction + single fused pallas_call
# --------------------------------------------------------------------------
@jax.jit
def forward(prep, head_idx, rel_idx, tail_idx):
    num_nodes = prep["feat"].shape[0]
    batch = head_idx.shape[0]
    b_pad = -(-batch // 8) * 8                  # sublane-aligned batch
    n_pad = max(2 * batch, 8)                   # fixed upper bound on unique batch nodes

    # --- subgraph over batch nodes (fixed padded size, fully jittable) ------------
    combined = jnp.concatenate([head_idx, tail_idx])
    unique_sorted = jnp.unique(combined, size=n_pad, fill_value=num_nodes)
    mask = jnp.zeros((num_nodes,), jnp.bool_).at[unique_sorted].set(True, mode="drop")

    ei = prep["global_edge_index"]
    sel = mask[ei[0]] & mask[ei[1]]
    remap_src = jnp.searchsorted(unique_sorted, ei[0])
    remap_dst = jnp.searchsorted(unique_sorted, ei[1])

    # dense normalized adjacency adj[dst, src] for mean aggregation, cast bf16 for MXU
    counts = jnp.zeros((n_pad, n_pad), jnp.float32).at[remap_dst, remap_src].add(
        sel.astype(jnp.float32), mode="drop")
    deg = jnp.maximum(counts.sum(axis=1, keepdims=True), 1.0)
    adj = (counts / deg).astype(jnp.bfloat16)

    # --- gathers (pad rows are inert: no edges, never selected by gh/gt) ----------
    x_cat = prep["feat"][unique_sorted]                          # (n_pad, 128) bf16
    head_pos = jnp.searchsorted(unique_sorted, head_idx)
    tail_pos = jnp.searchsorted(unique_sorted, tail_idx)
    rows = jnp.arange(batch)
    gh = jnp.zeros((b_pad, n_pad), jnp.float32).at[rows, head_pos].set(1.0)
    gt = jnp.zeros((b_pad, n_pad), jnp.float32).at[rows, tail_pos].set(1.0)
    rel_phase = jnp.zeros((b_pad, prep["rel_emb"].shape[1]), jnp.float32
                          ).at[:batch].set(prep["rel_emb"][rel_idx])

    # --- single fused Pallas kernel ------------------------------------------------
    scores_pad = pl.pallas_call(
        partial(_fused_kernel, GAMMA),
        out_shape=jax.ShapeDtypeStruct((b_pad, 128), jnp.float32),
        in_specs=[_vmem_spec() for _ in range(11)],
        out_specs=_vmem_spec(),
        compiler_params=pltpu.CompilerParams(vmem_limit_bytes=32 * 1024 * 1024),
    )(x_cat, adj, gh, gt, rel_phase,
      prep["wenc"], prep["benc"], prep["w1"], prep["b1"], prep["w2"], prep["b2"])

    return scores_pad[:batch, 0]


# --------------------------------------------------------------------------
# Deterministic parameter construction + packing to TPU-friendly layouts
# --------------------------------------------------------------------------
def make_model(key):
    ks = jax.random.split(key, 16)
    bloom_emb = jax.random.normal(ks[0], (NUM_NODES, BLOOM_DIM), jnp.float32)
    transE_emb = jax.random.normal(ks[1], (NUM_NODES, TRANSE_DIM), jnp.float32)
    wb = 0.1 * jax.random.normal(ks[2], (BLOOM_DIM, BLOOM_PROJ), jnp.float32)
    bb = 0.01 * jax.random.normal(ks[3], (BLOOM_PROJ,), jnp.float32)
    wt = 0.1 * jax.random.normal(ks[4], (TRANSE_DIM, TRANSE_PROJ), jnp.float32)
    bt = 0.01 * jax.random.normal(ks[5], (TRANSE_PROJ,), jnp.float32)
    w1_nb = 0.1 * jax.random.normal(ks[6], (ENC_DIM, HIDDEN), jnp.float32)
    w1_self = 0.1 * jax.random.normal(ks[7], (ENC_DIM, HIDDEN), jnp.float32)
    b1 = 0.01 * jax.random.normal(ks[8], (HIDDEN,), jnp.float32)
    w2_nb = 0.1 * jax.random.normal(ks[9], (HIDDEN, OUT), jnp.float32)
    w2_self = 0.1 * jax.random.normal(ks[10], (HIDDEN, OUT), jnp.float32)
    b2 = 0.01 * jax.random.normal(ks[11], (OUT,), jnp.float32)
    rel_emb = jax.random.uniform(ks[12], (NUM_REL, OUT // 2), jnp.float32,
                                 minval=-jnp.pi, maxval=jnp.pi)
    edge_index = jax.random.randint(ks[13], (2, NUM_EDGES), 0, NUM_NODES, dtype=jnp.int32)

    # Concatenated raw features, padded to 128 lanes (one gather feeds the encoder).
    feat = jnp.zeros((NUM_NODES, F_PAD), jnp.float32)
    feat = feat.at[:, :BLOOM_DIM].set(bloom_emb)
    feat = feat.at[:, BLOOM_DIM:BLOOM_DIM + TRANSE_DIM].set(transE_emb)

    # Block-diagonal encoder weight: [xb | xt] @ Wenc == [xb@Wb | xt@Wt]  (padded to 128).
    wenc = jnp.zeros((F_PAD, D_PAD), jnp.float32)
    wenc = wenc.at[:BLOOM_DIM, :BLOOM_PROJ].set(wb)
    wenc = wenc.at[BLOOM_DIM:BLOOM_DIM + TRANSE_DIM,
                   BLOOM_PROJ:BLOOM_PROJ + TRANSE_PROJ].set(wt)
    benc = jnp.zeros((1, D_PAD), jnp.float32)
    benc = benc.at[0, :BLOOM_PROJ].set(bb).at[0, BLOOM_PROJ:ENC_DIM].set(bt)

    def _pad_w(w):
        return jnp.zeros((D_PAD, D_PAD), jnp.float32).at[:w.shape[0], :w.shape[1]].set(w)

    # SAGE weights stacked so each layer is one [agg | x] @ W matmul (neighbor branch first).
    w1 = jnp.concatenate([_pad_w(w1_nb), _pad_w(w1_self)], axis=0)   # (256, 128)
    b1p = jnp.zeros((1, D_PAD), jnp.float32).at[0, :HIDDEN].set(b1)
    w2 = jnp.concatenate([_pad_w(w2_nb), _pad_w(w2_self)], axis=0)   # (256, 128)
    b2p = jnp.zeros((1, D_PAD), jnp.float32).at[0, :OUT].set(b2)

    return {
        "feat": feat.astype(jnp.bfloat16),
        "wenc": wenc.astype(jnp.bfloat16),
        "benc": benc,
        "w1": w1.astype(jnp.bfloat16),
        "b1": b1p,
        "w2": w2.astype(jnp.bfloat16),
        "b2": b2p,
        "rel_emb": rel_emb,
        "global_edge_index": edge_index,
    }


if __name__ == "__main__":
    key = jax.random.PRNGKey(0)
    pkey, ikey = jax.random.split(key)
    prep = make_model(pkey)

    k_h, k_r, k_t = jax.random.split(ikey, 3)
    batch = 8
    head_idx = jax.random.randint(k_h, (batch,), 0, NUM_NODES, dtype=jnp.int32)
    rel_idx = jax.random.randint(k_r, (batch,), 0, NUM_REL, dtype=jnp.int32)
    tail_idx = jax.random.randint(k_t, (batch,), 0, NUM_NODES, dtype=jnp.int32)

    scores = forward(prep, head_idx, rel_idx, tail_idx)
    scores = jax.block_until_ready(scores)
    assert scores.shape == (batch,) and scores.dtype == jnp.float32
    assert bool(jnp.all(jnp.isfinite(scores)))
    print("KERNEL_OK")
</pallas_src>

<mosaic_0001>
module attributes {stable_mosaic.version = 11 : i64} {
  func.func private @main(%arg0: i32) attributes {dimension_semantics = [#tpu.dimension_semantics<core_parallel>], iteration_bounds = array<i64: 2>, tpu.core_type = #tpu.core_type<sc_scalar_subcore>, window_params = []} {
    return
  }
}

module attributes {stable_mosaic.version = 11 : i64} {
  func.func private @main(%arg0: i32) attributes {dimension_semantics = [#tpu.dimension_semantics<core_parallel>], iteration_bounds = array<i64: 2>, tpu.core_type = #tpu.core_type<sc_scalar_subcore>, window_params = []} {
    return
  }
}

module attributes {stable_mosaic.version = 11 : i64} {
  func.func @_fused_kernel(%arg0: memref<16x128xbf16, #tpu.memory_space<vmem>>, %arg1: memref<16x16xbf16, #tpu.memory_space<vmem>>, %arg2: memref<8x16xf32, #tpu.memory_space<vmem>>, %arg3: memref<8x16xf32, #tpu.memory_space<vmem>>, %arg4: memref<8x32xf32, #tpu.memory_space<vmem>>, %arg5: memref<128x128xbf16, #tpu.memory_space<vmem>>, %arg6: memref<1x128xf32, #tpu.memory_space<vmem>>, %arg7: memref<256x128xbf16, #tpu.memory_space<vmem>>, %arg8: memref<1x128xf32, #tpu.memory_space<vmem>>, %arg9: memref<256x128xbf16, #tpu.memory_space<vmem>>, %arg10: memref<1x128xf32, #tpu.memory_space<vmem>>, %arg11: memref<8x128xf32, #tpu.memory_space<vmem>>) attributes {dimension_semantics = [], scalar_prefetch = 0 : i64, scratch_operands = 0 : i64, tpu.core_type = #tpu.core_type<tc>} {
    %c0 = arith.constant 0 : index
    %c0_0 = arith.constant 0 : index
    %0 = vector.load %arg0[%c0, %c0_0] : memref<16x128xbf16, #tpu.memory_space<vmem>>, vector<16x128xbf16>
    %c0_1 = arith.constant 0 : index
    %c0_2 = arith.constant 0 : index
    %1 = vector.load %arg5[%c0_1, %c0_2] : memref<128x128xbf16, #tpu.memory_space<vmem>>, vector<128x128xbf16>
    %cst = arith.constant dense<0.000000e+00> : vector<16x128xf32>
    %2 = tpu.matmul %0, %1, %cst {dimension_numbers = #tpu.dot_dimension_numbers<[1], [0], [0], [1], [0, 0, 1, 1], [], []>} : vector<16x128xbf16>, vector<128x128xbf16>, vector<16x128xf32> -> vector<16x128xf32>
    %c0_3 = arith.constant 0 : index
    %c0_4 = arith.constant 0 : index
    %3 = vector.load %arg6[%c0_3, %c0_4] : memref<1x128xf32, #tpu.memory_space<vmem>>, vector<1x128xf32>
    %4 = vector.broadcast %3 : vector<1x128xf32> to vector<16x128xf32>
    %5 = arith.addf %2, %4 : vector<16x128xf32>
    %6 = arith.truncf %5 : vector<16x128xf32> to vector<16x128xbf16>
    %c0_5 = arith.constant 0 : index
    %c0_6 = arith.constant 0 : index
    %7 = vector.load %arg1[%c0_5, %c0_6] : memref<16x16xbf16, #tpu.memory_space<vmem>>, vector<16x16xbf16>
    %cst_7 = arith.constant dense<0.000000e+00> : vector<16x128xf32>
    %8 = tpu.matmul %7, %6, %cst_7 {dimension_numbers = #tpu.dot_dimension_numbers<[1], [0], [0], [1], [0, 0, 1, 1], [], []>} : vector<16x16xbf16>, vector<16x128xbf16>, vector<16x128xf32> -> vector<16x128xf32>
    %9 = arith.truncf %8 : vector<16x128xf32> to vector<16x128xbf16>
    %10 = tpu.concatenate %9, %6 in 1 : vector<16x128xbf16>, vector<16x128xbf16> -> vector<16x256xbf16>
    %c0_8 = arith.constant 0 : index
    %c0_9 = arith.constant 0 : index
    %11 = vector.load %arg7[%c0_8, %c0_9] : memref<256x128xbf16, #tpu.memory_space<vmem>>, vector<256x128xbf16>
    %cst_10 = arith.constant dense<0.000000e+00> : vector<16x128xf32>
    %12 = tpu.matmul %10, %11, %cst_10 {dimension_numbers = #tpu.dot_dimension_numbers<[1], [0], [0], [1], [0, 0, 1, 1], [], []>} : vector<16x256xbf16>, vector<256x128xbf16>, vector<16x128xf32> -> vector<16x128xf32>
    %c0_11 = arith.constant 0 : index
    %c0_12 = arith.constant 0 : index
    %13 = vector.load %arg8[%c0_11, %c0_12] : memref<1x128xf32, #tpu.memory_space<vmem>>, vector<1x128xf32>
    %14 = vector.broadcast %13 : vector<1x128xf32> to vector<16x128xf32>
    %15 = arith.addf %12, %14 : vector<16x128xf32>
    %cst_13 = arith.constant 0.000000e+00 : f32
    %16 = vector.broadcast %cst_13 : f32 to vector<16x128xf32>
    %17 = arith.maximumf %15, %16 : vector<16x128xf32>
    %18 = arith.truncf %17 : vector<16x128xf32> to vector<16x128xbf16>
    %c0_14 = arith.constant 0 : index
    %c0_15 = arith.constant 0 : index
    %19 = vector.load %arg1[%c0_14, %c0_15] : memref<16x16xbf16, #tpu.memory_space<vmem>>, vector<16x16xbf16>
    %cst_16 = arith.constant dense<0.000000e+00> : vector<16x128xf32>
    %20 = tpu.matmul %19, %18, %cst_16 {dimension_numbers = #tpu.dot_dimension_numbers<[1], [0], [0], [1], [0, 0, 1, 1], [], []>} : vector<16x16xbf16>, vector<16x128xbf16>, vector<16x128xf32> -> vector<16x128xf32>
    %21 = arith.truncf %20 : vector<16x128xf32> to vector<16x128xbf16>
    %22 = tpu.concatenate %21, %18 in 1 : vector<16x128xbf16>, vector<16x128xbf16> -> vector<16x256xbf16>
    %c0_17 = arith.constant 0 : index
    %c0_18 = arith.constant 0 : index
    %23 = vector.load %arg9[%c0_17, %c0_18] : memref<256x128xbf16, #tpu.memory_space<vmem>>, vector<256x128xbf16>
    %cst_19 = arith.constant dense<0.000000e+00> : vector<16x128xf32>
    %24 = tpu.matmul %22, %23, %cst_19 {dimension_numbers = #tpu.dot_dimension_numbers<[1], [0], [0], [1], [0, 0, 1, 1], [], []>} : vector<16x256xbf16>, vector<256x128xbf16>, vector<16x128xf32> -> vector<16x128xf32>
    %c0_20 = arith.constant 0 : index
    %c0_21 = arith.constant 0 : index
    %25 = vector.load %arg10[%c0_20, %c0_21] : memref<1x128xf32, #tpu.memory_space<vmem>>, vector<1x128xf32>
    %26 = vector.broadcast %25 : vector<1x128xf32> to vector<16x128xf32>
    %27 = arith.addf %24, %26 : vector<16x128xf32>
    %c0_22 = arith.constant 0 : index
    %c0_23 = arith.constant 0 : index
    %28 = vector.load %arg2[%c0_22, %c0_23] : memref<8x16xf32, #tpu.memory_space<vmem>>, vector<8x16xf32>
    %cst_24 = arith.constant dense<0.000000e+00> : vector<8x128xf32>
    %29 = tpu.matmul %28, %27, %cst_24 {dimension_numbers = #tpu.dot_dimension_numbers<[1], [0], [0], [1], [0, 0, 1, 1], [], []>} : vector<8x16xf32>, vector<16x128xf32>, vector<8x128xf32> -> vector<8x128xf32>
    %c0_25 = arith.constant 0 : index
    %c0_26 = arith.constant 0 : index
    %30 = vector.load %arg3[%c0_25, %c0_26] : memref<8x16xf32, #tpu.memory_space<vmem>>, vector<8x16xf32>
    %cst_27 = arith.constant dense<0.000000e+00> : vector<8x128xf32>
    %31 = tpu.matmul %30, %27, %cst_27 {dimension_numbers = #tpu.dot_dimension_numbers<[1], [0], [0], [1], [0, 0, 1, 1], [], []>} : vector<8x16xf32>, vector<16x128xf32>, vector<8x128xf32> -> vector<8x128xf32>
    %32 = vector.extract_strided_slice %29 {offsets = [0, 0], sizes = [8, 32], strides = [1, 1]} : vector<8x128xf32> to vector<8x32xf32>
    %33 = vector.extract_strided_slice %29 {offsets = [0, 32], sizes = [8, 32], strides = [1, 1]} : vector<8x128xf32> to vector<8x32xf32>
    %34 = vector.extract_strided_slice %31 {offsets = [0, 0], sizes = [8, 32], strides = [1, 1]} : vector<8x128xf32> to vector<8x32xf32>
    %35 = vector.extract_strided_slice %31 {offsets = [0, 32], sizes = [8, 32], strides = [1, 1]} : vector<8x128xf32> to vector<8x32xf32>
    %c0_28 = arith.constant 0 : index
    %c0_29 = arith.constant 0 : index
    %36 = vector.load %arg4[%c0_28, %c0_29] : memref<8x32xf32, #tpu.memory_space<vmem>>, vector<8x32xf32>
    %37 = math.cos %36 : vector<8x32xf32>
    %c0_30 = arith.constant 0 : index
    %c0_31 = arith.constant 0 : index
    %38 = vector.load %arg4[%c0_30, %c0_31] : memref<8x32xf32, #tpu.memory_space<vmem>>, vector<8x32xf32>
    %39 = math.sin %38 : vector<8x32xf32>
    %40 = arith.mulf %32, %37 : vector<8x32xf32>
    %41 = arith.mulf %33, %39 : vector<8x32xf32>
    %42 = arith.subf %40, %41 : vector<8x32xf32>
    %43 = arith.subf %42, %34 : vector<8x32xf32>
    %44 = arith.mulf %32, %39 : vector<8x32xf32>
    %45 = arith.mulf %33, %37 : vector<8x32xf32>
    %46 = arith.addf %44, %45 : vector<8x32xf32>
    %47 = arith.subf %46, %35 : vector<8x32xf32>
    %48 = arith.mulf %43, %43 : vector<8x32xf32>
    %49 = arith.mulf %47, %47 : vector<8x32xf32>
    %50 = arith.addf %48, %49 : vector<8x32xf32>
    %cst_32 = arith.constant 9.99999996E-13 : f32
    %51 = vector.broadcast %cst_32 : f32 to vector<8x32xf32>
    %52 = arith.addf %50, %51 : vector<8x32xf32>
    %53 = math.sqrt %52 : vector<8x32xf32>
    %cst_33 = arith.constant dense<0.000000e+00> : vector<8xf32>
    %54 = vector.multi_reduction <add>, %53, %cst_33 [1] : vector<8x32xf32> to vector<8xf32>
    %55 = vector.shape_cast %54 : vector<8xf32> to vector<8x1xf32>
    %cst_34 = arith.constant 1.200000e+01 : f32
    %56 = vector.broadcast %cst_34 : f32 to vector<8x1xf32>
    %57 = arith.subf %56, %55 : vector<8x1xf32>
    %58 = vector.shape_cast %57 : vector<8x1xf32> to vector<8x1xf32>
    %59 = vector.broadcast %58 : vector<8x1xf32> to vector<8x128xf32>
    %c0_35 = arith.constant 0 : index
    %c0_36 = arith.constant 0 : index
    %60 = vector.load %arg11[%c0_35, %c0_36] : memref<8x128xf32, #tpu.memory_space<vmem>>, vector<8x128xf32>
    tpu.vector_store %arg11[%c0_35, %c0_36], %59 {strides = array<i32>} : memref<8x128xf32, #tpu.memory_space<vmem>>, vector<8x128xf32>,
    return
  }
}

</mosaic_0001>

<bundles_post_ra>
// kernel: custom-call.6
= control target key start
LH: loop header
LB: loop body
LE: loop exit
PB: predicated region body
PF: predicated region fallthrough
CT: control target
= control target key end

     0   :  { %s6_s0 = inlined_call_operand.vmem [shape: u32[200], index: 0, kind: output, shape index: {}]  }

// kernel: custom-call.10
= control target key start
LH: loop header
LB: loop body
LE: loop exit
PB: predicated region body
PF: predicated region fallthrough
CT: control target
= control target key end

     0   :  { %s6_s0 = inlined_call_operand.vmem [shape: u32[8], index: 0, kind: output, shape index: {}]  }

// kernel: forward.1
= control target key start
LH: loop header
LB: loop body
LE: loop exit
PB: predicated region body
PF: predicated region fallthrough
CT: control target
= control target key end

     0   :  { %v1243_v0 = vmov 0.0   ;;  %vm1244_vm0 = vmmov 0   ;;  %vm167_vm1 = vcmask 130048   ;;  %s1509_s5 = inlined_call_operand.vmem [shape: bf16[128,128], index: 5, kind: input, shape index: {}]   ;;  %s1510_s0 = inlined_call_operand.vmem [shape: bf16[16,128], index: 0, kind: input, shape index: {}]   ;;  %s1511_s1 = inlined_call_operand.vmem [shape: bf16[16,16], index: 1, kind: input, shape index: {}]   ;;  %s1512_s7 = inlined_call_operand.vmem [shape: bf16[256,128], index: 7, kind: input, shape index: {}]   ;;  %s1513_s6 = inlined_call_operand.vmem [shape: f32[1,128], index: 6, kind: input, shape index: {}]   ;;  %s1514_s9 = inlined_call_operand.vmem [shape: bf16[256,128], index: 9, kind: input, shape index: {}]   ;;  %s1515_s8 = inlined_call_operand.vmem [shape: f32[1,128], index: 8, kind: input, shape index: {}]   ;;  %s1516_s4 = inlined_call_operand.vmem [shape: f32[8,32], index: 4, kind: input, shape index: {}]   ;;  %s1517_s10 = inlined_call_operand.vmem [shape: f32[1,128], index: 10, kind: input, shape index: {}]   ;;  %s1518_s2 = inlined_call_operand.vmem [shape: f32[8,16], index: 2, kind: input, shape index: {}]   ;;  %s1519_s3 = inlined_call_operand.vmem [shape: f32[8,16], index: 3, kind: input, shape index: {}]   ;;  %s1520_s11 = inlined_call_operand.vmem [shape: f32[8,128], index: 11, kind: output, shape index: {}]  }
   0x1   :  { %1135 = vmatprep.subr.bf16.mxu0 %v1243_v0  ;;  %v1195_v1 = vld [vmem:[%s1509_s5 + $0x38] sm:$0xff]   ;;  %1151 = vmatprep.mubr.msk.bf16.mxu0 %vm1244_vm0, %v1243_v0  ;;  %v1196_v2 = vld [vmem:[%s1509_s5 + $0x30] sm:$0xff]   ;;  %v1197_v3 = vld [vmem:[%s1509_s5 + $0x28] sm:$0xff]  }
   0x2   :  { %1136 = vmatpush3.bf16.msra.mxu0 %v1195_v1  ;;  %v1198_v4 = vld [vmem:[%s1509_s5 + $0x20] sm:$0xff]   ;;  %v1199_v5 = vld [vmem:[%s1509_s5 + $0x18] sm:$0xff]   ;;  %v1200_v6 = vld [vmem:[%s1509_s5 + $0x10] sm:$0xff]  }
   0x3   :  { %1137 = vmatprep.subr.bf16.mxu0 %v1243_v0  ;;  %v1201_v7 = vld [vmem:[%s1509_s5 + $0x8] sm:$0xff]   ;;  %v1202_v8 = vld [vmem:[%s1509_s5] sm:$0xff]   ;;  %v1205_v10 = vld [vmem:[%s1512_s7 + $0x78] sm:$0xff]  }
   0x4   :  { %v1203_v9 = vld [vmem:[%s1510_s0] sm:$0xff]   ;;  %v1206_v11 = vld [vmem:[%s1512_s7 + $0x38] sm:$0xff]   ;;  %1083 = vmatprep.subr.bf16.mxu1 %v1205_v10  ;;  %v1207_v12 = vld [vmem:[%s1512_s7 + $0x70] sm:$0xff]  }
   0x5   :  { %1084 = vmatpush3.bf16.msra.mxu1 %v1206_v11  ;;  %v1208_v13 = vld [vmem:[%s1512_s7 + $0x30] sm:$0xff]   ;;  %v1209_v14 = vld [vmem:[%s1512_s7 + $0x68] sm:$0xff]   ;;  %v1211_v16 = vld [vmem:[%s1512_s7 + $0x60] sm:$0xff]  }
   0x6   :  { %1138 = vmatpush3.bf16.msra.mxu0 %v1196_v2  ;;  %1085 = vmatprep.subr.bf16.mxu1 %v1207_v12  ;;  %v1210_v15 = vld [vmem:[%s1512_s7 + $0x28] sm:$0xff]   ;;  %v1212_v17 = vld [vmem:[%s1512_s7 + $0x20] sm:$0xff]   ;;  %v1213_v18 = vld [vmem:[%s1512_s7 + $0x58] sm:$0xff]  }
   0x7   :  { %1139 = vmatprep.subr.bf16.mxu0 %v1243_v0  ;;  %v1214_v19 = vld [vmem:[%s1512_s7 + $0x18] sm:$0xff]   ;;  %v1215_v20 = vld [vmem:[%s1512_s7 + $0x50] sm:$0xff]   ;;  %v1217_v22 = vld [vmem:[%s1512_s7 + $0x48] sm:$0xff]  }
   0x8   :  { %v1216_v21 = vld [vmem:[%s1512_s7 + $0x10] sm:$0xff]   ;;  %v1015_v24 = vld [vmem:[%s1513_s6] ss:$0 sm:$0xff]  ;;  %v1218_v32 = vld [vmem:[%s1512_s7 + $0x8] sm:$0xff]  }
   0x9   :  { %1086 = vmatpush3.bf16.msra.mxu1 %v1208_v13  ;;  %v1204_v31 = vld [vmem:[%s1511_s1] sm:$0xff]   ;;  %v1221_v40 = vld [vmem:[%s1514_s9 + $0x78] sm:$0xff]   ;;  %v1223_v42 = vld [vmem:[%s1514_s9 + $0x70] sm:$0xff]  }
   0xa   :  { %1140 = vmatpush3.bf16.msra.mxu0 %v1197_v3  ;;  %1087 = vmatprep.subr.bf16.mxu1 %v1209_v14  ;;  %v1219_v33 = vld [vmem:[%s1512_s7 + $0x40] sm:$0xff]   ;;  %v1222_v41 = vld [vmem:[%s1514_s9 + $0x38] sm:$0xff]   ;;  %v1224_v43 = vld [vmem:[%s1514_s9 + $0x30] sm:$0xff]  }
   0xb   :  { %1141 = vmatprep.subr.bf16.mxu0 %v1243_v0  ;;  %v1220_v34 = vld [vmem:[%s1512_s7] sm:$0xff]   ;;  %v1225_v44 = vld [vmem:[%s1514_s9 + $0x68] sm:$0xff]   ;;  %v1229_v48 = vld [vmem:[%s1514_s9 + $0x58] sm:$0xff]  }
   0xc   :  { %v1226_v45 = vld [vmem:[%s1514_s9 + $0x28] sm:$0xff]   ;;  %v1227_v46 = vld [vmem:[%s1514_s9 + $0x60] sm:$0xff]   ;;  %v1230_v49 = vld [vmem:[%s1514_s9 + $0x18] sm:$0xff]  }
   0xd   :  { %1088 = vmatpush3.bf16.msra.mxu1 %v1210_v15  ;;  %v1228_v47 = vld [vmem:[%s1514_s9 + $0x20] sm:$0xff]   ;;  %v1231_v50 = vld [vmem:[%s1514_s9 + $0x50] sm:$0xff]   ;;  %v1233_v52 = vld [vmem:[%s1514_s9 + $0x48] sm:$0xff]  }
   0xe   :  { %1142 = vmatpush3.bf16.msra.mxu0 %v1198_v4  ;;  %1089 = vmatprep.subr.bf16.mxu1 %v1211_v16  ;;  %v1232_v51 = vld [vmem:[%s1514_s9 + $0x10] sm:$0xff]   ;;  %v1027_v56 = vld [vmem:[%s1515_s8] ss:$0 sm:$0xff]  ;;  %v1234_v2 = vld [vmem:[%s1514_s9 + $0x8] sm:$0xff]  }
   0xf   :  { %1143 = vmatprep.subr.bf16.mxu0 %v1243_v0  ;;  %v1235_v3 = vld [vmem:[%s1514_s9 + $0x40] sm:$0xff]  }
  0x10   :  { %v1236_v4 = vld [vmem:[%s1514_s9] sm:$0xff]  }
  0x11   :  { %1090 = vmatpush3.bf16.msra.mxu1 %v1212_v17  ;;  %v1469_v10 = vld [vmem:[%s1516_s4] sm:$0xff]  ;;  %s1251_s4 = smov 32  }
  0x12   :  { %1144 = vmatpush3.bf16.msra.mxu0 %v1199_v5  ;;  %1091 = vmatprep.subr.bf16.mxu1 %v1213_v18  ;;  %v762_v11 = vand.u32 2139095040, %v1469_v10  ;;  %v759_v18 = vand.u32 2147483647, %v1469_v10  ;;  %vm761_vm9 = vcmp.lt.s32.totalorder %v1469_v10, 0 }
  0x13   :  { %1145 = vmatprep.subr.bf16.mxu0 %v1243_v0 }
  0x14   :  { %v763_v12 = vshrl.u32 %v762_v11, 23  ;;  %vm760_vm10 = vcmp.le.f32.partialorder %v759_v18, 0.7853982 }
  0x15   :  { %1092 = vmatpush3.bf16.msra.mxu1 %v1214_v19  ;;  %v766_v19 = vand.u32 8388607, %v759_v18 }
  0x16   :  { %1146 = vmatpush3.bf16.msra.mxu0 %v1200_v6  ;;  %1093 = vmatprep.subr.bf16.mxu1 %v1215_v20  ;;  %v1064_v13 = vadd.s32 4294967169, %v763_v12 }
  0x17   :  { %1147 = vmatprep.subr.bf16.mxu0 %v1243_v0 }
  0x18   :  { %v769_v14 = vadd.s32 1, %v1064_v13 }
  0x19   :  { %1094 = vmatpush3.bf16.msra.mxu1 %v1216_v21  ;;  %v1245_v21 = vmov 683565275  }
  0x1a   :  { %1148 = vmatpush3.bf16.msra.mxu0 %v1201_v7  ;;  %1095 = vmatprep.subr.bf16.mxu1 %v1217_v22  ;;  %vm770_vm2 = vcmp.gt.s32.totalorder %v769_v14, 0 }
  0x1b   :  { %1149 = vmatprep.subr.bf16.mxu0 %v1243_v0  ;;  %v771_v15 = vsel %vm770_vm2, %v769_v14, 0 }
  0x1c   :  { %v773_v16 = vand.u32 31, %v771_v15  ;;  %v772_v20 = vshrl.u32 %v771_v15, 5 }
  0x1d   :  { %1096 = vmatpush3.bf16.msra.mxu1 %v1218_v32 }
  0x1e   :  { %1150 = vmatpush3.bf16.msra.mxu0 %v1202_v8  ;;  %1097 = vmatprep.subr.bf16.mxu1 %v1219_v33  ;;  %v774_v17 = vsub.s32 32, %v773_v16  ;;  %v776_v22 = vshll.u32 %v1245_v21, %v773_v16  ;;  %v1248_v33 = vmov 2102212464   ;;  %vm791_vm3 = vcmp.lt.s32.totalorder %v772_v20, 1 }
  0x1f   :  { %1155 = vmatprep.subr.bf16.mxu0 %v1243_v0  ;;  %vm794_vm4 = vcmp.lt.s32.totalorder %v772_v20, 4  ;;  %vm792_vm5 = vcmp.lt.s32.totalorder %v772_v20, 2  ;;  %vm793_vm6 = vcmp.lt.s32.totalorder %v772_v20, 3 }
  0x21   :  { %1152 = vmatmul.mubr.bf16.vlgmr.msra.gmra.mxu0 %v1203_v9  ;;  %1098 = vmatpush3.bf16.msra.mxu1 %v1220_v34  ;;  %v783_v34 = vshrl.u32 %v1248_v33, %v774_v17 }
  0x22   :  { %1157 = vmatprep.mubr.msk.bf16.mxu0 %vm1244_vm0, %v1243_v0  ;;  %1107 = vmatprep.subr.bf16.mxu1 %v1221_v40  ;;  %v1250_v40 = vmov 1326507024  }
  0xe1   :  { %v152_v23 = vpop.f32.mrf.mxu0 }
  0xe2   :  { %v153_v27 = vadd.f32 %v1015_v24, %v152_v23  ;;  %v1246_v23 = vmov 2475754826  }
  0xe3   :  { %v1153_v25 = vpop.f32.mrf.mxu0 }
  0xe4   :  { %v779_v25 = vshll.u32 %v1246_v23, %v773_v16 }
  0xe5   :  { %v155_v26 = vpop.f32.mrf.mxu0 }
  0xe6   :  { %v156_v28 = vadd.f32 %v1015_v24, %v155_v26  ;;  %v777_v24 = vshrl.u32 %v1246_v23, %v774_v17  ;;  %v1247_v26 = vmov 2131351028  }
  0xe7   :  { %v1154_v29 = vpop.f32.mrf.mxu0 }
  0xe8   :  { %v159_v30 = vpack.c.bf16 %v156_v28, %v153_v27  ;;  %v780_v27 = vshrl.u32 %v1247_v26, %v774_v17  ;;  %v782_v28 = vshll.u32 %v1247_v26, %v773_v16  ;;  %v767_v29 = vor.u32 8388608, %v766_v19 }
  0xea   :  { %1156 = vmatpush3.bf16.msra.mxu0 %v159_v30  ;;  %380 = vmatprep.mubr.bf16.mxu1 %v159_v30  ;;  %v775_v30 = vshrl.u32 %v1245_v21, %v774_v17  ;;  %v781_v32 = vor.u32 %v780_v27, %v779_v25 }
  0xeb   :  { %1161 = vmatprep.subr.bf16.mxu0 %v1243_v0 }
  0xed   :  { %1158 = vmatmul.mubr.msk.bf16.vlgmr.msra.gmra.mxu0 %vm167_vm1, %v1204_v31 }
  0xee   :  { %1163 = vmatprep.mubr.msk.bf16.mxu0 %vm1244_vm0, %v1243_v0 }
 0x1ad   :  { %v205_v35 = vpop.f32.mrf.mxu0 }
 0x1af   :  { %v1159_v36 = vpop.f32.mrf.mxu0 }
 0x1b0   :  { %v1249_v36 = vmov 920167782  }
 0x1b1   :  { %v208_v37 = vpop.f32.mrf.mxu0 }
 0x1b2   :  { %v212_v38 = vpack.c.bf16 %v208_v37, %v205_v35  ;;  %v785_v35 = vshll.u32 %v1248_v33, %v773_v16  ;;  %v786_v37 = vshrl.u32 %v1249_v36, %v774_v17 }
 0x1b3   :  { %v1160_v39 = vpop.f32.mrf.mxu0 }
 0x1b4   :  { %381 = vmatmul.mubr.bf16.vlgmr.msra.gmra.mxu1 %v212_v38  ;;  %v788_v38 = vshll.u32 %v1249_v36, %v773_v16  ;;  %v784_v39 = vor.u32 %v783_v34, %v782_v28 }
 0x1b5   :  { %1108 = vmatpush3.bf16.msra.mxu1 %v1222_v41  ;;  %v789_v41 = vshrl.u32 %v1250_v40, %v774_v17 }
 0x1b6   :  { %1109 = vmatprep.subr.bf16.mxu1 %v1223_v42  ;;  %v787_v42 = vor.u32 %v786_v37, %v785_v35 }
 0x1b9   :  { %1110 = vmatpush3.bf16.msra.mxu1 %v1224_v43  ;;  %v790_v43 = vor.u32 %v789_v41, %v788_v38 }
 0x1ba   :  { %1111 = vmatprep.subr.bf16.mxu1 %v1225_v44  ;;  %v796_v44 = vsel %vm794_vm4, %v784_v39, 2102212464 }
 0x1bd   :  { %1112 = vmatpush3.bf16.msra.mxu1 %v1226_v45 }
 0x1be   :  { %1113 = vmatprep.subr.bf16.mxu1 %v1227_v46  ;;  %v807_v46 = vshll.u32 %v767_v29, 8 }
 0x1c1   :  { %1114 = vmatpush3.bf16.msra.mxu1 %v1228_v47 }
 0x1c2   :  { %1115 = vmatprep.subr.bf16.mxu1 %v1229_v48  ;;  %v797_v48 = vsel %vm793_vm6, %v781_v32, %v796_v44 }
 0x1c5   :  { %1116 = vmatpush3.bf16.msra.mxu1 %v1230_v49  ;;  %v800_v49 = vsel %vm794_vm4, %v787_v42, 920167782 }
 0x1c6   :  { %1117 = vmatprep.subr.bf16.mxu1 %v1231_v50  ;;  %v803_v50 = vsel %vm791_vm3, %v781_v32, %v784_v39 }
 0x1c9   :  { %1118 = vmatpush3.bf16.msra.mxu1 %v1232_v51  ;;  %v801_v51 = vsel %vm793_vm6, %v784_v39, %v800_v49 }
 0x1ca   :  { %1119 = vmatprep.subr.bf16.mxu1 %v1233_v52  ;;  %v804_v52 = vsel %vm794_vm4, %v790_v43, 1326507024 }
 0x1cd   :  { %1120 = vmatpush3.bf16.msra.mxu1 %v1234_v2 }
 0x1ce   :  { %1121 = vmatprep.subr.bf16.mxu1 %v1235_v3 }
 0x1d1   :  { %1122 = vmatpush3.bf16.msra.mxu1 %v1236_v4 }
 0x274   :  { %v1099_v53 = vpop.f32.mrf.mxu1 }
 0x276   :  { %v1100_v54 = vpop.f32.mrf.mxu1 }
 0x277   :  { %v1101_v55 = vadd.f32 %v1100_v54, %v1099_v53  ;;  %v805_v54 = vsel %vm793_vm6, %v787_v42, %v804_v52 }
 0x278   :  { %v1102_v57 = vpop.f32.mrf.mxu1 }
 0x279   :  { %v383_v59 = vadd.f32 %v1101_v55, %v1027_v56 }
 0x27a   :  { %v1103_v58 = vpop.f32.mrf.mxu1 }
 0x27b   :  { %v1104_v60 = vadd.f32 %v1103_v58, %v1102_v57  ;;  %v389_v62 = vmax.f32 %v383_v59, 0.0 }
 0x27d   :  { %v386_v61 = vadd.f32 %v1104_v60, %v1027_v56  ;;  %v806_v56 = vsel %vm792_vm5, %v803_v50, %v805_v54  ;;  %v684_v54 = vld [vmem:[%s1519_s3] sm:$0xff] }
 0x27e   :  { %v1478_v59 = vmul.u32.u64.low %v807_v46, %v806_v56  ;;  %v1479_v60 = vmul.u32.u64.high %v807_v46, %v806_v56, %v1478_v59 }
 0x27f   :  { %v390_v63 = vmax.f32 %v386_v61, 0.0 }
 0x281   :  { %v391_v1 = vpack.c.bf16 %v390_v63, %v389_v62 }
 0x283   :  { %1162 = vmatpush3.bf16.msra.mxu0 %v391_v1  ;;  %601 = vmatprep.mubr.bf16.mxu1 %v391_v1 }
 0x284   :  { %1167 = vmatprep.subr.mxu0 %v1243_v0 }
 0x286   :  { %1164 = vmatmul.mubr.msk.bf16.vlgmr.msra.gmra.mxu0 %vm167_vm1, %v1204_v31  ;;  %v778_v31 = vor.u32 %v777_v24, %v776_v22 }
 0x287   :  { %1171 = vmatprep.mubr.msk.f32.mxu0 %vm1244_vm0, %v1243_v0 }
 0x288   :  { %v799_v45 = vsel %vm791_vm3, %v778_v31, %v781_v32  ;;  %v795_v47 = vsel %vm791_vm3, %v775_v30, %v778_v31  ;;  %vm851_vm3 = vweird.f32 %v1469_v10 }
 0x289   :  { %v802_v53 = vsel %vm792_vm5, %v799_v45, %v801_v51  ;;  %v798_v55 = vsel %vm792_vm5, %v795_v47, %v797_v48 }
 0x28a   :  { %v1475_v57 = vmul.u32.u64.low %v807_v46, %v802_v53  ;;  %v1476_v58 = vmul.u32.u64.high %v807_v46, %v802_v53, %v1475_v57  ;;  %v814_v61 = vmul.u32 %v807_v46, %v798_v55  ;;  %v610_v53 = vld [vmem:[%s1518_s2] sm:$0xff]  ;;  %s1252_s2 = smov 96  }
 0x28c   :  { %v817_v62 = vadd.s32 1, %v1476_v58  ;;  %vm816_vm7 = vc.u32 %v1479_v60, %v1475_v57  ;;  %v815_v11 = vadd.s32 %v1475_v57, %v1479_v60 }
 0x28e   :  { %v818_v63 = vsel %vm816_vm7, %v817_v62, %v1476_v58 }
 0x28f   :  { %v819_v1 = vadd.s32 %v818_v63, %v814_v61 }
 0x291   :  { %v820_v2 = vadd.s32 536870912, %v819_v1 }
 0x293   :  { %v821_v3 = vshrl.u32 %v820_v2, 30 }
 0x295   :  { %v822_v4 = vshll.u32 %v821_v3, 30  ;;  %v845_v25 = vsub.s32 4, %v821_v3 }
 0x297   :  { %v846_v28 = vsel %vm761_vm9, %v845_v25, %v821_v3 }
 0x298   :  { %v848_v30 = vsel %vm760_vm10, 0, %v846_v28 }
 0x299   :  { %v955_v31 = vadd.s32 3, %v848_v30  ;;  %v852_v33 = vand.u32 3, %v848_v30 }
 0x29b   :  { %v956_v32 = vand.u32 3, %v955_v31  ;;  %vm857_vm12 = vcmp.eq.s32.totalorder %v852_v33, 2  ;;  %vm854_vm14 = vcmp.eq.s32.totalorder %v852_v33, 0  ;;  %vm853_vm2 = vcmp.lt.s32.totalorder %v852_v33, 2 }
 0x29d   :  { %vm961_vm11 = vcmp.eq.s32.totalorder %v956_v32, 2  ;;  %vm958_vm13 = vcmp.eq.s32.totalorder %v956_v32, 0  ;;  %vm957_vm15 = vcmp.lt.s32.totalorder %v956_v32, 2 }
 0x346   :  { %v426_v5 = vpop.f32.mrf.mxu0 }
 0x348   :  { %v1165_v6 = vpop.f32.mrf.mxu0 }
 0x34a   :  { %v429_v7 = vpop.f32.mrf.mxu0 }
 0x34b   :  { %v433_v8 = vpack.c.bf16 %v429_v7, %v426_v5  ;;  %v823_v5 = vsub.s32 %v819_v1, %v822_v4 }
 0x34c   :  { %v1166_v9 = vpop.f32.mrf.mxu0 }
 0x34d   :  { %602 = vmatmul.mubr.bf16.vlgmr.msra.gmra.mxu1 %v433_v8  ;;  %v825_v6 = vsub.s32 0, %v823_v5 }
 0x34f   :  { %v1065_v7 = vmin.u32 %v825_v6, %v823_v5 }
 0x351   :  { %v827_v8 = vclz %v1065_v7 }
 0x353   :  { %v1066_v9 = vadd.s32 4294967294, %v827_v8 }
 0x355   :  { %vm1067_vm8 = vcmp.lt.s32.totalorder %v1066_v9, 0 }
 0x356   :  { %v830_v12 = vsel %vm1067_vm8, 0, %v1066_v9 }
 0x357   :  { %v831_v13 = vsub.s32 32, %v830_v12  ;;  %v832_v14 = vshll.u32 %v823_v5, %v830_v12  ;;  %v835_v15 = vsub.s32 4294967266, %v830_v12 }
 0x359   :  { %v833_v16 = vshrl.u32 %v815_v11, %v831_v13  ;;  %v836_v17 = vadd.s32 127, %v835_v15 }
 0x35b   :  { %v834_v19 = vor.u32 %v833_v16, %v832_v14  ;;  %v837_v20 = vshll.u32 %v836_v17, 23 }
 0x35d   :  { %v838_v21 = vor.u32 4788187, %v837_v20  ;;  %v841_v22 = vcvt.s32.f32 %v834_v19 }
 0x35f   :  { %v839_v23 = vand.u32 2147483647, %v838_v21 }
 0x361   :  { %v842_v24 = vmul.f32 %v841_v22, %v839_v23 }
 0x363   :  { %v843_v26 = vxor.u32 2147483648, %v842_v24 }
 0x365   :  { %v844_v27 = vsel %vm761_vm9, %v843_v26, %v842_v24 }
 0x366   :  { %v847_v29 = vsel %vm760_vm10, %v1469_v10, %v844_v27  ;;  %v1045_v10 = vld [vmem:[%s1517_s10] ss:$0 sm:$0xff] }
 0x367   :  { %1237 = vcosq.f32 %v847_v29 }
 0x368   :  { %1239 = vsinq.f32 %v847_v29 }
 0x374   :  { %v1238_v34 = vpop.eup %1237 }
 0x375   :  { %v1240_v35 = vpop.eup %1239  ;;  %v858_v36 = vxor.u32 2147483648, %v1238_v34 }
 0x376   :  { %v855_v37 = vxor.u32 2147483648, %v1240_v35 }
 0x377   :  { %v963_v18 = vsel %vm961_vm11, %v858_v36, %v1240_v35  ;;  %v859_v38 = vsel %vm857_vm12, %v858_v36, %v1240_v35 }
 0x378   :  { %v960_v39 = vsel %vm958_vm13, %v1238_v34, %v855_v37  ;;  %v856_v40 = vsel %vm854_vm14, %v1238_v34, %v855_v37 }
 0x379   :  { %v964_v41 = vsel %vm957_vm15, %v960_v39, %v963_v18  ;;  %v860_v42 = vsel %vm853_vm2, %v856_v40, %v859_v38 }
 0x37a   :  { %v965_v43 = vsel %vm851_vm3, nan, %v964_v41  ;;  %v861_v44 = vsel %vm851_vm3, nan, %v860_v42 }
 0x37b   :  { %968 = vrot.lane.b32.xlu0 %v965_v43, %s1251_s4 }
 0x37f   :  { %980 = vrot.lane.b32.xlu0 %v861_v44, %s1251_s4 }
 0x3ed   :  { %v969_v55 = vpop.permute.xlu0 %968 }
 0x3f1   :  { %v981_v58 = vpop.permute.xlu0 %980 }
 0x40d   :  { %v1123_v45 = vpop.f32.mrf.mxu1 }
 0x40f   :  { %v1124_v46 = vpop.f32.mrf.mxu1 }
 0x410   :  { %v1125_v49 = vadd.f32 %v1124_v46, %v1123_v45 }
 0x411   :  { %v1126_v47 = vpop.f32.mrf.mxu1 }
 0x412   :  { %v604_v52 = vadd.f32 %v1125_v49, %v1045_v10 }
 0x413   :  { %v1127_v48 = vpop.f32.mrf.mxu1 }
 0x414   :  { %v1128_v50 = vadd.f32 %v1127_v48, %v1126_v47 }
 0x416   :  { %v607_v51 = vadd.f32 %v1128_v50, %v1045_v10 }
 0x418   :  { %1168 = vmatpush3.msra.mxu0 %v607_v51 }
 0x419   :  { %1169 = vmatprep.subr.mxu0 %v1243_v0 }
 0x41a   :  { %1170 = vmatpush3.msra.mxu0 %v604_v52 }
 0x41b   :  { %1172 = vmatmul.mubr.msk.f32.vlgmr.msra.gmra.mxu0 %vm167_vm1, %v610_v53  ;;  %1174 = vmatprep.subr.mxu0 %v1243_v0 }
 0x41c   :  { %1175 = vmatpush3.msra.mxu0 %v607_v51  ;;  %1178 = vmatprep.mubr.msk.f32.mxu0 %vm1244_vm0, %v1243_v0 }
 0x41d   :  { %1176 = vmatprep.subr.mxu0 %v1243_v0 }
 0x41e   :  { %1177 = vmatpush3.msra.mxu0 %v604_v52 }
 0x41f   :  { %1179 = vmatmul.mubr.msk.f32.vlgmr.msra.gmra.mxu0 %vm167_vm1, %v684_v54  ;;  %vm1005_vm1 = vcmask 261120  }
 0x4db   :  { %v680_v56 = vpop.f32.mrf.mxu0 }
 0x4dc   :  { %v971_v57 = vmul.f32 %v969_v55, %v680_v56  ;;  %v983_v61 = vmul.f32 %v981_v58, %v680_v56  ;;  %v966_v63 = vmul.f32 %v861_v44, %v680_v56  ;;  %v978_v3 = vmul.f32 %v965_v43, %v680_v56 }
 0x4dd   :  { %v1173_v59 = vpop.f32.mrf.mxu0 }
 0x4de   :  { %973 = vrot.lane.b32.xlu1 %v971_v57, %s1252_s2 }
 0x4df   :  { %v754_v60 = vpop.f32.mrf.mxu0 }
 0x4e0   :  { %990 = vrot.lane.b32.xlu0 %v754_v60, %s1252_s2 }
 0x4e1   :  { %v1180_v62 = vpop.f32.mrf.mxu0 }
 0x4e2   :  { %985 = vrot.lane.b32.xlu1 %v983_v61, %s1252_s2 }
 0x550   :  { %v974_v1 = vpop.permute.xlu1 %973 }
 0x551   :  { %v976_v2 = vsub.f32 %v966_v63, %v974_v1 }
 0x552   :  { %v991_v4 = vpop.permute.xlu0 %990 }
 0x553   :  { %v977_v5 = vsub.f32 %v976_v2, %v754_v60 }
 0x554   :  { %v986_v0 = vpop.permute.xlu1 %985 }
 0x555   :  { %v988_v6 = vadd.f32 %v986_v0, %v978_v3  ;;  %v994_v8 = vmul.f32 %v977_v5, %v977_v5 }
 0x557   :  { %v993_v7 = vsub.f32 %v988_v6, %v991_v4 }
 0x559   :  { %v995_v9 = vmul.f32 %v993_v7, %v993_v7 }
 0x55b   :  { %v996_v11 = vadd.f32 %v995_v9, %v994_v8 }
 0x55d   :  { %v997_v12 = vadd.f32 1e-12, %v996_v11 }
 0x55f   :  { %1241 = vrsqrt.f32 %v997_v12  ;;  %vm1000_vm0 = vcmp.eq.f32.partialorder %v997_v12, inf  ;;  %v1003_v15 = vand.u32 2147483648, %v997_v12  ;;  %vm1002_vm4 = vcmp.eq.f32.partialorder %v997_v12, 0.0 }
 0x56c   :  { %v1242_v13 = vpop.eup %1241 }
 0x56d   :  { %v999_v14 = vmul.f32 %v1242_v13, %v997_v12 }
 0x56f   :  { %v1001_v16 = vsel %vm1000_vm0, %v997_v12, %v999_v14 }
 0x570   :  { %v1004_v17 = vsel %vm1002_vm4, %v1003_v15, %v1001_v16 }
 0x571   :  { %v1006_v19 = vsel %vm1005_vm1, %v1004_v17, 0.0 }
 0x572   :  { %1007 = vadd.xlane.f32.xlu1 %v1006_v19 }
 0x5fb   :  { %v1008_v20 = vpop.xlane.xlu1 %1007 }
 0x5fc   :  { %v1009_v21 = vsub.f32 12.0, %v1008_v20 }
 0x5fe   :  { %1010 = vst [vmem:[%s1520_s11] sm:$0xff] %v1009_v21 }

</bundles_post_ra>
